<compile_context>
chip_gen: v5e
topology: v5e:2x2
jax: 0.10.0
libtpu: 0.0.40
codegen_flags: <defaults>
</compile_context>

<pallas_src>
import jax
import jax.numpy as jnp
from jax import lax
from jax.experimental import pallas as pl
from jax.experimental.pallas import tpu as pltpu


def neuralcf_kernel(uid_ref, iid_ref,
                    ut_ref, it_ref,
                    w1u_ref, w1i_ref, b1_ref,
                    w2_ref, b2_ref,
                    wpg_ref, wpm_ref, bp_ref,
                    out_ref):
    f32 = jnp.float32
    tb = uid_ref.shape[-1]
    nu = ut_ref.shape[-1]
    ni = it_ref.shape[-1]

    # --- Fused embedding gather: one-hot^T @ merged tables on the MXU -------
    # (0/1 weights with f32 accumulation -> bit-exact row gather).
    iota_u = lax.broadcasted_iota(jnp.int32, (nu, tb), 0)
    iota_i = lax.broadcasted_iota(jnp.int32, (ni, tb), 0)
    onehot_u = jnp.where(iota_u == uid_ref[...], 1.0, 0.0).astype(ut_ref.dtype)
    onehot_i = jnp.where(iota_i == iid_ref[...], 1.0, 0.0).astype(it_ref.dtype)
    u_rows = jnp.dot(ut_ref[...], onehot_u, preferred_element_type=f32)   # (2D, TB)
    i_rows = jnp.dot(it_ref[...], onehot_i, preferred_element_type=f32)   # (2D, TB)

    # --- GMF branch: elementwise product, reduced into the predict partial
    # immediately (wpg is zero on the MLP half of the merged rows). ----------
    pred = jnp.sum(u_rows * i_rows * wpg_ref[...], axis=0, keepdims=True)  # (1, TB)

    # --- MLP layer 1: two bf16 MXU matmuls; the zero-padded weight halves
    # select only the MLP part of the merged rows. f32 accumulation. ---------
    h1 = jnp.dot(w1u_ref[...], u_rows.astype(w1u_ref.dtype),
                 preferred_element_type=f32)
    h1 = h1 + jnp.dot(w1i_ref[...], i_rows.astype(w1i_ref.dtype),
                      preferred_element_type=f32)
    h1 = jnp.maximum(h1 + b1_ref[...], 0.0)                                # (H1, TB)
    # TODO(synk): Dropout(0.2) is treated as identity (inference / eval mode).

    # --- MLP layer 2. --------------------------------------------------------
    h2 = jnp.dot(w2_ref[...], h1.astype(w2_ref.dtype),
                 preferred_element_type=f32)
    h2 = jnp.maximum(h2 + b2_ref[...], 0.0)                                # (H2, TB)

    # --- Predict layer (MLP half) + bias; output stays lane-dense (1, TB). --
    pred = pred + jnp.sum(h2 * wpm_ref[...], axis=0, keepdims=True)
    out_ref[...] = pred + bp_ref[0, 0]


def _round_up(x, m):
    return ((x + m - 1) // m) * m


def init_params(key, num_users, num_items, embedding_dim=64, mlp_dims=(128, 64)):
    """Torch-like logical parameters (embeddings stored bf16, weights f32)."""
    ks = jax.random.split(key, 10)
    d = embedding_dim
    h1, h2 = mlp_dims

    def lin(kw, kb, fan_in, fan_out):
        # mimic torch.nn.Linear default init: U(-1/sqrt(fan_in), 1/sqrt(fan_in))
        bound = 1.0 / jnp.sqrt(jnp.float32(fan_in))
        w = jax.random.uniform(kw, (fan_in, fan_out), jnp.float32, -bound, bound)
        b = jax.random.uniform(kb, (fan_out,), jnp.float32, -bound, bound)
        return w, b

    params = {
        # nn.Embedding default init N(0, 1); stored bf16 (dominant HBM stream).
        'gmf_user_emb': jax.random.normal(ks[0], (num_users, d), jnp.float32).astype(jnp.bfloat16),
        'gmf_item_emb': jax.random.normal(ks[1], (num_items, d), jnp.float32).astype(jnp.bfloat16),
        'mlp_user_emb': jax.random.normal(ks[2], (num_users, d), jnp.float32).astype(jnp.bfloat16),
        'mlp_item_emb': jax.random.normal(ks[3], (num_items, d), jnp.float32).astype(jnp.bfloat16),
    }
    params['w1'], params['b1'] = lin(ks[4], ks[5], 2 * d, h1)   # Linear(2D -> 128)
    params['w2'], params['b2'] = lin(ks[6], ks[7], h1, h2)      # Linear(128 -> 64)
    params['wp'], params['bp'] = lin(ks[8], ks[9], d + h2, 1)   # Linear(D+64 -> 1)
    return params


def pack_params(params, *, mxu_dtype=jnp.bfloat16):
    """Pack logical params into the transposed / merged kernel layout."""
    d = params['gmf_user_emb'].shape[1]
    h1 = params['w1'].shape[1]
    nu = params['gmf_user_emb'].shape[0]
    ni = params['gmf_item_emb'].shape[0]
    nu_pad = _round_up(nu, 128)
    ni_pad = _round_up(ni, 128)

    def merge_t(gmf_emb, mlp_emb, n, n_pad):
        # (2D, N_pad): rows 0:D = GMF emb^T, rows D:2D = MLP emb^T, zero-padded cols.
        t = jnp.concatenate([gmf_emb.astype(jnp.float32),
                             mlp_emb.astype(jnp.float32)], axis=1).T
        t = jnp.pad(t, ((0, 0), (0, n_pad - n)))
        return t.astype(mxu_dtype)

    w1 = params['w1'].astype(jnp.float32)                       # (2D, H1)
    zeros = jnp.zeros((h1, d), jnp.float32)
    # Zero-padded so the matmul with the merged (2D, TB) rows only "sees" the
    # MLP half (sublanes D:2D) of the gathered rows.
    w1u_t = jnp.concatenate([zeros, w1[:d, :].T], axis=1).astype(mxu_dtype)   # (H1, 2D)
    w1i_t = jnp.concatenate([zeros, w1[d:, :].T], axis=1).astype(mxu_dtype)   # (H1, 2D)

    wp = params['wp'].astype(jnp.float32)                       # (D + H2, 1)
    wpg = jnp.concatenate([wp[:d, 0], jnp.zeros((d,), jnp.float32)])[:, None]  # (2D, 1)
    wpm = wp[d:, :]                                             # (H2, 1)

    return {
        'user_table_t': merge_t(params['gmf_user_emb'], params['mlp_user_emb'], nu, nu_pad),
        'item_table_t': merge_t(params['gmf_item_emb'], params['mlp_item_emb'], ni, ni_pad),
        'w1u_t': w1u_t,
        'w1i_t': w1i_t,
        'b1_t': params['b1'].astype(jnp.float32)[:, None],              # (H1, 1)
        'w2_t': params['w2'].astype(jnp.float32).T.astype(mxu_dtype),   # (H2, H1)
        'b2_t': params['b2'].astype(jnp.float32)[:, None],              # (H2, 1)
        'wpg': wpg,
        'wpm': wpm,
        'bp': params['bp'].reshape(1, 1).astype(jnp.float32),           # (1, 1) -> SMEM
    }


def neuralcf_forward(users, items, kparams, *, tile_b=4096):
    """Fused NeuralCF forward. Returns (B,) f32 predictions."""
    b = users.shape[0]
    # Batch lives on the lane axis -> tile must be a multiple of 128.
    # Default 4096 amortizes per-grid-step overhead; keep >=2 steps on big
    # batches so dimension_semantics=("parallel",) can use both v7x cores.
    tb = min(_round_up(tile_b, 128), _round_up(b, 128))
    b_pad = _round_up(b, tb)

    users = jnp.pad(users.astype(jnp.int32), (0, b_pad - b)).reshape(1, b_pad)
    items = jnp.pad(items.astype(jnp.int32), (0, b_pad - b)).reshape(1, b_pad)

    d2, nu_pad = kparams['user_table_t'].shape
    ni_pad = kparams['item_table_t'].shape[1]
    h1 = kparams['w1u_t'].shape[0]
    h2 = kparams['w2_t'].shape[0]

    grid = (b_pad // tb,)

    def batch_block(i):
        return (0, i)

    def resident(i):
        return (0, 0)

    in_specs = [
        pl.BlockSpec((1, tb), batch_block),                  # user ids (lane-dense)
        pl.BlockSpec((1, tb), batch_block),                  # item ids (lane-dense)
        pl.BlockSpec((d2, nu_pad), resident),                # merged user table^T
        pl.BlockSpec((d2, ni_pad), resident),                # merged item table^T
        pl.BlockSpec((h1, d2), resident),                    # W1 (user half)^T, zero-padded
        pl.BlockSpec((h1, d2), resident),                    # W1 (item half)^T, zero-padded
        pl.BlockSpec((h1, 1), resident),                     # b1
        pl.BlockSpec((h2, h1), resident),                    # W2^T
        pl.BlockSpec((h2, 1), resident),                     # b2
        pl.BlockSpec((d2, 1), resident),                     # predict weights (GMF half)
        pl.BlockSpec((h2, 1), resident),                     # predict weights (MLP half)
        pl.BlockSpec(memory_space=pltpu.MemorySpace.SMEM),   # bp scalar
    ]
    out_specs = pl.BlockSpec((1, tb), batch_block)

    out = pl.pallas_call(
        neuralcf_kernel,
        out_shape=jax.ShapeDtypeStruct((1, b_pad), jnp.float32),
        grid=grid,
        in_specs=in_specs,
        out_specs=out_specs,
        compiler_params=pltpu.CompilerParams(
            dimension_semantics=("parallel",),
            # In-kernel one-hot scratch + large batch tiles need more than the
            # v5e 16 MiB scoped-VMEM default; 48 MiB still fits v7x (64 MiB).
            vmem_limit_bytes=48 * 1024 * 1024,
        ),
    )(users, items,
      kparams['user_table_t'], kparams['item_table_t'],
      kparams['w1u_t'], kparams['w1i_t'], kparams['b1_t'],
      kparams['w2_t'], kparams['b2_t'],
      kparams['wpg'], kparams['wpm'], kparams['bp'])

    return out[0, :b]                                        # .squeeze() -> (B,)


def neuralcf_reference(users, items, params):
    """Pure-JAX reference mirroring the kernel's precision choices."""
    f32 = jnp.float32
    bf16 = jnp.bfloat16
    d = params['gmf_user_emb'].shape[1]
    gu = params['gmf_user_emb'][users].astype(f32)
    gi = params['gmf_item_emb'][items].astype(f32)
    mu = params['mlp_user_emb'][users].astype(f32)
    mi = params['mlp_item_emb'][items].astype(f32)
    gmf = gu * gi
    w1 = params['w1'].astype(bf16).astype(f32)
    h1 = jnp.maximum(mu @ w1[:d] + mi @ w1[d:] + params['b1'], 0.0)
    h1 = h1.astype(bf16).astype(f32)                         # mirror in-kernel MXU cast
    w2 = params['w2'].astype(bf16).astype(f32)
    h2 = jnp.maximum(h1 @ w2 + params['b2'], 0.0)
    wp = params['wp'][:, 0]
    return gmf @ wp[:d] + h2 @ wp[d:] + params['bp'][0]


if __name__ == "__main__":
    key = jax.random.PRNGKey(0)
    k_param, k_u, k_i = jax.random.split(key, 3)

    num_users, num_items = 100, 200
    embedding_dim = 64
    mlp_dims = (128, 64)
    batch = 8

    params = init_params(k_param, num_users, num_items, embedding_dim, mlp_dims)
    kparams = pack_params(params)

    users = jax.random.randint(k_u, (batch,), 0, num_users, dtype=jnp.int32)
    items = jax.random.randint(k_i, (batch,), 0, num_items, dtype=jnp.int32)

    pred = neuralcf_forward(users, items, kparams)
    pred = jax.block_until_ready(pred)

    ref = neuralcf_reference(users, items, params)
    assert pred.shape == (batch,)
    max_err = float(jnp.max(jnp.abs(pred - ref)))
    assert jnp.allclose(pred, ref, atol=2e-3, rtol=2e-3), max_err

    print("KERNEL_OK")
</pallas_src>

<mosaic_0001>
module attributes {stable_mosaic.version = 11 : i64} {
  func.func @neuralcf_kernel(%arg0: i32, %arg1: memref<1x128xi32, #tpu.memory_space<vmem>>, %arg2: memref<1x128xi32, #tpu.memory_space<vmem>>, %arg3: memref<128x128xbf16, #tpu.memory_space<vmem>>, %arg4: memref<128x256xbf16, #tpu.memory_space<vmem>>, %arg5: memref<128x128xbf16, #tpu.memory_space<vmem>>, %arg6: memref<128x128xbf16, #tpu.memory_space<vmem>>, %arg7: memref<128x1xf32, #tpu.memory_space<vmem>>, %arg8: memref<64x128xbf16, #tpu.memory_space<vmem>>, %arg9: memref<64x1xf32, #tpu.memory_space<vmem>>, %arg10: memref<128x1xf32, #tpu.memory_space<vmem>>, %arg11: memref<64x1xf32, #tpu.memory_space<vmem>>, %arg12: memref<1x1xf32, #tpu.memory_space<smem>>, %arg13: memref<1x128xf32, #tpu.memory_space<vmem>>) attributes {dimension_semantics = [#tpu.dimension_semantics<parallel>], iteration_bounds = array<i64: 1>, scalar_prefetch = 0 : i64, scratch_operands = 0 : i64, tpu.core_type = #tpu.core_type<tc>, window_params = [{transform_indices = @transform_0, window_bounds = array<i64: 1, 128>}, {transform_indices = @transform_1, window_bounds = array<i64: 1, 128>}, {pipeline_mode = #tpu.pipeline_mode<synchronous>, transform_indices = @transform_2, window_bounds = array<i64: 128, 128>}, {pipeline_mode = #tpu.pipeline_mode<synchronous>, transform_indices = @transform_3, window_bounds = array<i64: 128, 256>}, {pipeline_mode = #tpu.pipeline_mode<synchronous>, transform_indices = @transform_4, window_bounds = array<i64: 128, 128>}, {pipeline_mode = #tpu.pipeline_mode<synchronous>, transform_indices = @transform_5, window_bounds = array<i64: 128, 128>}, {pipeline_mode = #tpu.pipeline_mode<synchronous>, transform_indices = @transform_6, window_bounds = array<i64: 128, 1>}, {pipeline_mode = #tpu.pipeline_mode<synchronous>, transform_indices = @transform_7, window_bounds = array<i64: 64, 128>}, {pipeline_mode = #tpu.pipeline_mode<synchronous>, transform_indices = @transform_8, window_bounds = array<i64: 64, 1>}, {pipeline_mode = #tpu.pipeline_mode<synchronous>, transform_indices = @transform_9, window_bounds = array<i64: 128, 1>}, {pipeline_mode = #tpu.pipeline_mode<synchronous>, transform_indices = @transform_10, window_bounds = array<i64: 64, 1>}, {transform_indices = @transform_11, window_bounds = array<i64: 1, 1>}, {transform_indices = @transform_12, window_bounds = array<i64: 1, 128>}]} {
    %0 = tpu.iota {dimensions = array<i32: 0>} : vector<128x128xi32>
    %1 = tpu.iota {dimensions = array<i32: 0>} : vector<256x128xi32>
    %c0 = arith.constant 0 : index
    %c0_0 = arith.constant 0 : index
    %2 = vector.load %arg1[%c0, %c0_0] : memref<1x128xi32, #tpu.memory_space<vmem>>, vector<1x128xi32>
    %3 = vector.broadcast %2 : vector<1x128xi32> to vector<128x128xi32>
    %4 = arith.cmpi eq, %0, %3 : vector<128x128xi32>
    %cst = arith.constant 1.000000e+00 : f32
    %cst_1 = arith.constant 0.000000e+00 : f32
    %5 = vector.broadcast %cst : f32 to vector<128x128xf32>
    %6 = vector.broadcast %cst_1 : f32 to vector<128x128xf32>
    %7 = arith.select %4, %5, %6 : vector<128x128xi1>, vector<128x128xf32>
    %8 = arith.truncf %7 : vector<128x128xf32> to vector<128x128xbf16>
    %c0_2 = arith.constant 0 : index
    %c0_3 = arith.constant 0 : index
    %9 = vector.load %arg2[%c0_2, %c0_3] : memref<1x128xi32, #tpu.memory_space<vmem>>, vector<1x128xi32>
    %10 = vector.broadcast %9 : vector<1x128xi32> to vector<256x128xi32>
    %11 = arith.cmpi eq, %1, %10 : vector<256x128xi32>
    %cst_4 = arith.constant 1.000000e+00 : f32
    %cst_5 = arith.constant 0.000000e+00 : f32
    %12 = vector.broadcast %cst_4 : f32 to vector<256x128xf32>
    %13 = vector.broadcast %cst_5 : f32 to vector<256x128xf32>
    %14 = arith.select %11, %12, %13 : vector<256x128xi1>, vector<256x128xf32>
    %15 = arith.truncf %14 : vector<256x128xf32> to vector<256x128xbf16>
    %c0_6 = arith.constant 0 : index
    %c0_7 = arith.constant 0 : index
    %16 = vector.load %arg3[%c0_6, %c0_7] : memref<128x128xbf16, #tpu.memory_space<vmem>>, vector<128x128xbf16>
    %cst_8 = arith.constant dense<0.000000e+00> : vector<128x128xf32>
    %17 = tpu.matmul %16, %8, %cst_8 {dimension_numbers = #tpu.dot_dimension_numbers<[1], [0], [0], [1], [0, 0, 1, 1], [], []>} : vector<128x128xbf16>, vector<128x128xbf16>, vector<128x128xf32> -> vector<128x128xf32>
    %c0_9 = arith.constant 0 : index
    %c0_10 = arith.constant 0 : index
    %18 = vector.load %arg4[%c0_9, %c0_10] : memref<128x256xbf16, #tpu.memory_space<vmem>>, vector<128x256xbf16>
    %cst_11 = arith.constant dense<0.000000e+00> : vector<128x128xf32>
    %19 = tpu.matmul %18, %15, %cst_11 {dimension_numbers = #tpu.dot_dimension_numbers<[1], [0], [0], [1], [0, 0, 1, 1], [], []>} : vector<128x256xbf16>, vector<256x128xbf16>, vector<128x128xf32> -> vector<128x128xf32>
    %20 = arith.mulf %17, %19 : vector<128x128xf32>
    %c0_12 = arith.constant 0 : index
    %c0_13 = arith.constant 0 : index
    %21 = vector.load %arg10[%c0_12, %c0_13] : memref<128x1xf32, #tpu.memory_space<vmem>>, vector<128x1xf32>
    %22 = vector.broadcast %21 : vector<128x1xf32> to vector<128x128xf32>
    %23 = arith.mulf %20, %22 : vector<128x128xf32>
    %cst_14 = arith.constant dense<0.000000e+00> : vector<128xf32>
    %24 = vector.multi_reduction <add>, %23, %cst_14 [0] : vector<128x128xf32> to vector<128xf32>
    %25 = vector.shape_cast %24 : vector<128xf32> to vector<1x128xf32>
    %c0_15 = arith.constant 0 : index
    %c0_16 = arith.constant 0 : index
    %26 = vector.load %arg5[%c0_15, %c0_16] : memref<128x128xbf16, #tpu.memory_space<vmem>>, vector<128x128xbf16>
    %27 = arith.truncf %17 : vector<128x128xf32> to vector<128x128xbf16>
    %cst_17 = arith.constant dense<0.000000e+00> : vector<128x128xf32>
    %28 = tpu.matmul %26, %27, %cst_17 {dimension_numbers = #tpu.dot_dimension_numbers<[1], [0], [0], [1], [0, 0, 1, 1], [], []>} : vector<128x128xbf16>, vector<128x128xbf16>, vector<128x128xf32> -> vector<128x128xf32>
    %c0_18 = arith.constant 0 : index
    %c0_19 = arith.constant 0 : index
    %29 = vector.load %arg6[%c0_18, %c0_19] : memref<128x128xbf16, #tpu.memory_space<vmem>>, vector<128x128xbf16>
    %30 = arith.truncf %19 : vector<128x128xf32> to vector<128x128xbf16>
    %cst_20 = arith.constant dense<0.000000e+00> : vector<128x128xf32>
    %31 = tpu.matmul %29, %30, %cst_20 {dimension_numbers = #tpu.dot_dimension_numbers<[1], [0], [0], [1], [0, 0, 1, 1], [], []>} : vector<128x128xbf16>, vector<128x128xbf16>, vector<128x128xf32> -> vector<128x128xf32>
    %32 = arith.addf %28, %31 : vector<128x128xf32>
    %c0_21 = arith.constant 0 : index
    %c0_22 = arith.constant 0 : index
    %33 = vector.load %arg7[%c0_21, %c0_22] : memref<128x1xf32, #tpu.memory_space<vmem>>, vector<128x1xf32>
    %34 = vector.broadcast %33 : vector<128x1xf32> to vector<128x128xf32>
    %35 = arith.addf %32, %34 : vector<128x128xf32>
    %cst_23 = arith.constant 0.000000e+00 : f32
    %36 = vector.broadcast %cst_23 : f32 to vector<128x128xf32>
    %37 = arith.maximumf %35, %36 : vector<128x128xf32>
    %c0_24 = arith.constant 0 : index
    %c0_25 = arith.constant 0 : index
    %38 = vector.load %arg8[%c0_24, %c0_25] : memref<64x128xbf16, #tpu.memory_space<vmem>>, vector<64x128xbf16>
    %39 = arith.truncf %37 : vector<128x128xf32> to vector<128x128xbf16>
    %cst_26 = arith.constant dense<0.000000e+00> : vector<64x128xf32>
    %40 = tpu.matmul %38, %39, %cst_26 {dimension_numbers = #tpu.dot_dimension_numbers<[1], [0], [0], [1], [0, 0, 1, 1], [], []>} : vector<64x128xbf16>, vector<128x128xbf16>, vector<64x128xf32> -> vector<64x128xf32>
    %c0_27 = arith.constant 0 : index
    %c0_28 = arith.constant 0 : index
    %41 = vector.load %arg9[%c0_27, %c0_28] : memref<64x1xf32, #tpu.memory_space<vmem>>, vector<64x1xf32>
    %42 = vector.broadcast %41 : vector<64x1xf32> to vector<64x128xf32>
    %43 = arith.addf %40, %42 : vector<64x128xf32>
    %cst_29 = arith.constant 0.000000e+00 : f32
    %44 = vector.broadcast %cst_29 : f32 to vector<64x128xf32>
    %45 = arith.maximumf %43, %44 : vector<64x128xf32>
    %c0_30 = arith.constant 0 : index
    %c0_31 = arith.constant 0 : index
    %46 = vector.load %arg11[%c0_30, %c0_31] : memref<64x1xf32, #tpu.memory_space<vmem>>, vector<64x1xf32>
    %47 = vector.broadcast %46 : vector<64x1xf32> to vector<64x128xf32>
    %48 = arith.mulf %45, %47 : vector<64x128xf32>
    %cst_32 = arith.constant dense<0.000000e+00> : vector<128xf32>
    %49 = vector.multi_reduction <add>, %48, %cst_32 [0] : vector<64x128xf32> to vector<128xf32>
    %50 = vector.shape_cast %49 : vector<128xf32> to vector<1x128xf32>
    %51 = arith.addf %25, %50 : vector<1x128xf32>
    %c0_33 = arith.constant 0 : index
    %c0_34 = arith.constant 0 : index
    %52 = memref.load %arg12[%c0_33, %c0_34] : memref<1x1xf32, #tpu.memory_space<smem>>
    %53 = vector.broadcast %52 : f32 to vector<1x128xf32>
    %54 = arith.addf %51, %53 : vector<1x128xf32>
    %c0_35 = arith.constant 0 : index
    %c0_36 = arith.constant 0 : index
    %55 = vector.load %arg13[%c0_35, %c0_36] : memref<1x128xf32, #tpu.memory_space<vmem>>, vector<1x128xf32>
    tpu.vector_store %arg13[%c0_35, %c0_36], %54 {strides = array<i32>} : memref<1x128xf32, #tpu.memory_space<vmem>>, vector<1x128xf32>,
    return
  }
  func.func @transform_0(%arg0: i32) -> (i32, i32) {
    %c0_i32 = arith.constant 0 : i32
    %c0_i32_0 = arith.constant 0 : i32
    return %c0_i32, %arg0 : i32, i32
  }
  func.func @transform_1(%arg0: i32) -> (i32, i32) {
    %c0_i32 = arith.constant 0 : i32
    %c0_i32_0 = arith.constant 0 : i32
    return %c0_i32, %arg0 : i32, i32
  }
  func.func @transform_2(%arg0: i32) -> (i32, i32) {
    %c0_i32 = arith.constant 0 : i32
    %c0_i32_0 = arith.constant 0 : i32
    %c0_i32_1 = arith.constant 0 : i32
    return %c0_i32, %c0_i32_0 : i32, i32
  }
  func.func @transform_3(%arg0: i32) -> (i32, i32) {
    %c0_i32 = arith.constant 0 : i32
    %c0_i32_0 = arith.constant 0 : i32
    %c0_i32_1 = arith.constant 0 : i32
    return %c0_i32, %c0_i32_0 : i32, i32
  }
  func.func @transform_4(%arg0: i32) -> (i32, i32) {
    %c0_i32 = arith.constant 0 : i32
    %c0_i32_0 = arith.constant 0 : i32
    %c0_i32_1 = arith.constant 0 : i32
    return %c0_i32, %c0_i32_0 : i32, i32
  }
  func.func @transform_5(%arg0: i32) -> (i32, i32) {
    %c0_i32 = arith.constant 0 : i32
    %c0_i32_0 = arith.constant 0 : i32
    %c0_i32_1 = arith.constant 0 : i32
    return %c0_i32, %c0_i32_0 : i32, i32
  }
  func.func @transform_6(%arg0: i32) -> (i32, i32) {
    %c0_i32 = arith.constant 0 : i32
    %c0_i32_0 = arith.constant 0 : i32
    %c0_i32_1 = arith.constant 0 : i32
    return %c0_i32, %c0_i32_0 : i32, i32
  }
  func.func @transform_7(%arg0: i32) -> (i32, i32) {
    %c0_i32 = arith.constant 0 : i32
    %c0_i32_0 = arith.constant 0 : i32
    %c0_i32_1 = arith.constant 0 : i32
    return %c0_i32, %c0_i32_0 : i32, i32
  }
  func.func @transform_8(%arg0: i32) -> (i32, i32) {
    %c0_i32 = arith.constant 0 : i32
    %c0_i32_0 = arith.constant 0 : i32
    %c0_i32_1 = arith.constant 0 : i32
    return %c0_i32, %c0_i32_0 : i32, i32
  }
  func.func @transform_9(%arg0: i32) -> (i32, i32) {
    %c0_i32 = arith.constant 0 : i32
    %c0_i32_0 = arith.constant 0 : i32
    %c0_i32_1 = arith.constant 0 : i32
    return %c0_i32, %c0_i32_0 : i32, i32
  }
  func.func @transform_10(%arg0: i32) -> (i32, i32) {
    %c0_i32 = arith.constant 0 : i32
    %c0_i32_0 = arith.constant 0 : i32
    %c0_i32_1 = arith.constant 0 : i32
    return %c0_i32, %c0_i32_0 : i32, i32
  }
  func.func @transform_11(%arg0: i32) -> (i32, i32) {
    %c0_i32 = arith.constant 0 : i32
    %c0_i32_0 = arith.constant 0 : i32
    %c0_i32_1 = arith.constant 0 : i32
    return %c0_i32, %c0_i32_0 : i32, i32
  }
  func.func @transform_12(%arg0: i32) -> (i32, i32) {
    %c0_i32 = arith.constant 0 : i32
    %c0_i32_0 = arith.constant 0 : i32
    return %c0_i32, %arg0 : i32, i32
  }
}

</mosaic_0001>

<bundles_post_ra>
// kernel: tpu_custom_call.1
= control target key start
LH: loop header
LB: loop body
LE: loop exit
PB: predicated region body
PF: predicated region fallthrough
CT: control target
= control target key end

     0   :  { %v43_v0 = vlaneseq  ;;  %s2337_s0 = inlined_call_operand.vmem [shape: s32[1,128], index: 0, kind: input, shape index: {}]   ;;  %s2338_s1 = inlined_call_operand.vmem [shape: s32[1,128], index: 1, kind: input, shape index: {}]   ;;  %s2339_s2 = inlined_call_operand.vmem [shape: bf16[128,128], index: 2, kind: input, shape index: {}]   ;;  %s2340_s3 = inlined_call_operand.vmem [shape: bf16[128,256], index: 3, kind: input, shape index: {}]   ;;  %s2341_s4 = inlined_call_operand.vmem [shape: bf16[128,128], index: 4, kind: input, shape index: {}]   ;;  %s2342_s5 = inlined_call_operand.vmem [shape: bf16[128,128], index: 5, kind: input, shape index: {}]   ;;  %s2343_s6 = inlined_call_operand.vmem [shape: f32[128,1], index: 6, kind: input, shape index: {}]   ;;  %s2344_s7 = inlined_call_operand.vmem [shape: bf16[64,128], index: 7, kind: input, shape index: {}]   ;;  %s2345_s8 = inlined_call_operand.vmem [shape: f32[64,1], index: 8, kind: input, shape index: {}]   ;;  %s2346_s9 = inlined_call_operand.vmem [shape: f32[128,1], index: 9, kind: input, shape index: {}]   ;;  %s2347_s10 = inlined_call_operand.vmem [shape: f32[64,1], index: 10, kind: input, shape index: {}]   ;;  %s2348_s11 = inlined_call_operand.<no memory space> [shape: f32[1,1], index: 11, kind: input, shape index: {}]   ;;  %s2349_s12 = inlined_call_operand.hbm [shape: f32[1,128], index: 12, kind: output, shape index: {}]  }
   0x1   :  { %18 = vsyncpa [#allocation4], 0  ;;  %v1640_v2 = vld [vmem:[%s2337_s0] ss:$0 sm:$0xff]  ;;  %v1567_v9 = vmov 1.0|1.0  }
   0x2   :  { %v1635_v1 = vshrl.u32 %v43_v0, 7  ;;  %v1657_v10 = vld [vmem:[%s2338_s1] ss:$0 sm:$0xff]  ;;  %v525_v25 = vld [vmem:[%s2346_s9 + $0x10] sm:$0xff]  ;;  %v1568_v28 = vmov 0   ;;  %v1468_v32 = vld [vmem:[%s2339_s2 + $0x18] sm:$0xff] }
   0x3   :  { %1537 = vset.pattern.permute.xlu1 %v1568_v28  ;;  %1536 = vset.pattern.permute.xlu0 %v1568_v28  ;;  %v1470_v33 = vld [vmem:[%s2339_s2 + $0x28] sm:$0xff]  ;;  %v912_v38 = vld [vmem:[%s2343_s6 + $0x70] sm:$0xff]  ;;  %v523_v39 = vld [vmem:[%s2346_s9] sm:$0xff]  ;;  %s1569_s18 = smov [#allocation3]  }
   0x4   :  { %v58_v3 = vadd.s32 112, %v1635_v1  ;;  %v59_v4 = vadd.s32 120, %v1635_v1  ;;  %v56_v5 = vadd.s32 96, %v1635_v1  ;;  %v57_v6 = vadd.s32 104, %v1635_v1  ;;  %551 = vperm.xlu1 %1537, %v525_v25   ;;  %1538 = vset.pattern.permute.xlu2 %v1568_v28  ;;  %v1465_v40 = vld [vmem:[%s2339_s2] sm:$0xff]  ;;  %v908_v46 = vld [vmem:[%s2343_s6 + $0x50] sm:$0xff] }
   0x5   :  { %v54_v7 = vadd.s32 80, %v1635_v1  ;;  %v55_v8 = vadd.s32 88, %v1635_v1  ;;  %v52_v11 = vadd.s32 64, %v1635_v1  ;;  %v53_v12 = vadd.s32 72, %v1635_v1  ;;  %541 = vperm.xlu0 %1536, %v523_v39   ;;  %v1291_v41 = vld [vmem:[%s2340_s3] sm:$0xf] }
   0x6   :  { %vm92_vm0 = vcmp.eq.s32.totalorder %v58_v3, %v1640_v2  ;;  %vm93_vm1 = vcmp.eq.s32.totalorder %v59_v4, %v1640_v2  ;;  %vm90_vm2 = vcmp.eq.s32.totalorder %v56_v5, %v1640_v2  ;;  %vm91_vm3 = vcmp.eq.s32.totalorder %v57_v6, %v1640_v2  ;;  %v1474_v42 = vld [vmem:[%s2340_s3 + $0x4] sm:$0xf0]  ;;  %v1469_v50 = vld [vmem:[%s2339_s2 + $0x20] sm:$0xff]  ;;  %v1471_v51 = vld [vmem:[%s2339_s2 + $0x30] sm:$0xff]  ;;  %s1230_s19 = sshll.u32 %s1569_s18, 4  ;;  %s1231_s19 = int_to_ptr.vmem [resolvable:$true] %s1230_s19 }
   0x7   :  { %vm1273_vm4 = vmpackc.low %vm93_vm1, %vm92_vm0  ;;  %vm88_vm6 = vcmp.eq.s32.totalorder %v54_v7, %v1640_v2  ;;  %vm89_vm7 = vcmp.eq.s32.totalorder %v55_v8, %v1640_v2  ;;  %vm134_vm8 = vcmp.eq.s32.totalorder %v58_v3, %v1657_v10  ;;  %vm135_vm9 = vcmp.eq.s32.totalorder %v59_v4, %v1657_v10  ;;  %v524_v47 = vld [vmem:[%s2346_s9 + $0x8] sm:$0xff]  ;;  %v913_v59 = vld [vmem:[%s2343_s6 + $0x78] sm:$0xff] }
   0x8   :  { %1509 = vmatpush.bf16.msk.msra.mxu2 %vm1273_vm4, %v1567_v9  ;;  %1510 = vmatpush.bf16.msk.msra.mxu3 %vm1273_vm4, %v1567_v9  ;;  %vm1275_vm5 = vmpackc.low %vm91_vm3, %vm90_vm2  ;;  %vm86_vm11 = vcmp.eq.s32.totalorder %v52_v11, %v1640_v2  ;;  %vm87_vm12 = vcmp.eq.s32.totalorder %v53_v12, %v1640_v2  ;;  %v50_v13 = vadd.s32 48, %v1635_v1  ;;  %v51_v14 = vadd.s32 56, %v1635_v1  ;;  %v907_v56 = vld [vmem:[%s2343_s6 + $0x48] sm:$0xff]  ;;  %v1299_v60 = vld [vmem:[%s2340_s3 + $0x10] sm:$0xf] }
   0x9   :  { %1274 = vmatpush.bf16.msk.msra.mxu0 %vm1273_vm4, %v1567_v9  ;;  %vm1277_vm10 = vmpackc.low %vm89_vm7, %vm88_vm6  ;;  %vm132_vm14 = vcmp.eq.s32.totalorder %v56_v5, %v1657_v10  ;;  %vm133_vm15 = vcmp.eq.s32.totalorder %v57_v6, %v1657_v10  ;;  %v48_v15 = vadd.s32 32, %v1635_v1  ;;  %v49_v16 = vadd.s32 40, %v1635_v1  ;;  %v911_v57 = vld [vmem:[%s2343_s6 + $0x68] sm:$0xff]  ;;  %v1476_v61 = vld [vmem:[%s2340_s3 + $0x14] sm:$0xf0]  ;;  %991 = vperm.xlu2 %1538, %v913_v59  }
   0xa   :  { %vm1353_vm13 = vmpackc.low %vm135_vm9, %vm134_vm8  ;;  %vm84_vm1 = vcmp.eq.s32.totalorder %v50_v13, %v1640_v2  ;;  %vm85_vm2 = vcmp.eq.s32.totalorder %v51_v14, %v1640_v2  ;;  %vm130_vm4 = vcmp.eq.s32.totalorder %v54_v7, %v1657_v10  ;;  %v46_v18 = vadd.s32 16, %v1635_v1  ;;  %v1466_v58 = vld [vmem:[%s2339_s2 + $0x8] sm:$0xff]  ;;  %v902_v63 = vld [vmem:[%s2343_s6 + $0x20] sm:$0xff] }
   0xb   :  { %vm1279_vm0 = vmpackc.low %vm87_vm12, %vm86_vm11  ;;  %1354 = vmatpush.bf16.msk.msra.mxu1 %vm1353_vm13, %v1567_v9  ;;  %vm82_vm7 = vcmp.eq.s32.totalorder %v48_v15, %v1640_v2  ;;  %vm83_vm8 = vcmp.eq.s32.totalorder %v49_v16, %v1640_v2  ;;  %v47_v19 = vadd.s32 24, %v1635_v1  ;;  %vm129_vm11 = vcmp.eq.s32.totalorder %v53_v12, %v1657_v10  ;;  %v906_v0 = vld [vmem:[%s2343_s6 + $0x40] sm:$0xff]  ;;  %v1472_v3 = vld [vmem:[%s2339_s2 + $0x38] sm:$0xff] }
   0xc   :  { %1511 = vmatpush.bf16.msk.msra.mxu2 %vm1275_vm5, %v1567_v9  ;;  %1512 = vmatpush.bf16.msk.msra.mxu3 %vm1275_vm5, %v1567_v9  ;;  %vm1355_vm3 = vmpackc.low %vm133_vm15, %vm132_vm14  ;;  %v1710_v21 = vadd.s32 8, %v1635_v1  ;;  %vm80_vm13 = vcmp.eq.s32.totalorder %v46_v18, %v1640_v2  ;;  %v74_v22 = vadd.s32 240, %v1635_v1  ;;  %v75_v23 = vadd.s32 248, %v1635_v1  ;;  %v910_v5 = vld [vmem:[%s2343_s6 + $0x60] sm:$0xff]  ;;  %v901_v6 = vld [vmem:[%s2343_s6 + $0x18] sm:$0xff] }
   0xd   :  { %1276 = vmatpush.bf16.msk.msra.mxu0 %vm1275_vm5, %v1567_v9  ;;  %vm131_vm5 = vcmp.eq.s32.totalorder %v55_v8, %v1657_v10  ;;  %vm1687_vm6 = vmpackc.low %vm85_vm2, %vm84_vm1  ;;  %vm81_vm14 = vcmp.eq.s32.totalorder %v47_v19, %v1640_v2  ;;  %vm127_vm1 = vcmp.eq.s32.totalorder %v51_v14, %v1657_v10  ;;  %v72_v26 = vadd.s32 224, %v1635_v1  ;;  %986 = vperm.xlu1 %1537, %v912_v38   ;;  %v905_v7 = vld [vmem:[%s2343_s6 + $0x38] sm:$0xff]  ;;  %v1467_v8 = vld [vmem:[%s2339_s2 + $0x10] sm:$0xff] }
   0xe   :  { %vm1357_vm9 = vmpackc.low %vm131_vm5, %vm130_vm4  ;;  %vm79_vm4 = vcmp.eq.s32.totalorder %v1710_v21, %v1640_v2  ;;  %vm150_vm5 = vcmp.eq.s32.totalorder %v74_v22, %v1657_v10  ;;  %v73_v27 = vadd.s32 232, %v1635_v1  ;;  %v70_v30 = vadd.s32 208, %v1635_v1  ;;  %546 = vperm.xlu0 %1536, %v524_v47   ;;  %v909_v12 = vld [vmem:[%s2343_s6 + $0x58] sm:$0xff]  ;;  %v900_v14 = vld [vmem:[%s2343_s6 + $0x10] sm:$0xff] }
   0xf   :  { %1356 = vmatpush.bf16.msk.msra.mxu1 %vm1355_vm3, %v1567_v9  ;;  %vm1705_vm12 = vmpackc.low %vm83_vm8, %vm82_vm7  ;;  %vm78_vm3 = vcmp.eq.s32.totalorder %v1635_v1, %v1640_v2  ;;  %vm124_vm8 = vcmp.eq.s32.totalorder %v48_v15, %v1657_v10  ;;  %v71_v31 = vadd.s32 216, %v1635_v1  ;;  %v68_v36 = vadd.s32 192, %v1635_v1  ;;  %v1293_v2 = vld [vmem:[%s2340_s3 + $0x8] sm:$0xf0]  ;;  %v1475_v15 = vld [vmem:[%s2340_s3 + $0x14] sm:$0xf] }
  0x10   :  { %1513 = vmatpush.bf16.msk.msra.mxu2 %vm1277_vm10, %v1567_v9  ;;  %1514 = vmatpush.bf16.msk.msra.mxu3 %vm1277_vm10, %v1567_v9  ;;  %vm1728_vm2 = vmpackc.low %vm81_vm14, %vm80_vm13  ;;  %vm149_vm13 = vcmp.eq.s32.totalorder %v73_v27, %v1657_v10  ;;  %v69_v37 = vadd.s32 200, %v1635_v1  ;;  %v66_v43 = vadd.s32 176, %v1635_v1  ;;  %v67_v44 = vadd.s32 184, %v1635_v1  ;;  %v1315_v20 = vld [vmem:[%s2340_s3 + $0x30] sm:$0xf]  ;;  %v528_v24 = vld [vmem:[%s2346_s9 + $0x28] sm:$0xff] }
  0x11   :  { %1278 = vmatpush.bf16.msk.msra.mxu0 %vm1277_vm10, %v1567_v9  ;;  %vm128_vm10 = vcmp.eq.s32.totalorder %v52_v11, %v1657_v10  ;;  %v1292_v45 = vor.u32 %v1474_v42, %v1291_v41  ;;  %v64_v48 = vadd.s32 160, %v1635_v1  ;;  %v65_v49 = vadd.s32 168, %v1635_v1  ;;  %976 = vperm.xlu2 %1538, %v910_v5   ;;  %v1477_v25 = vld [vmem:[%s2340_s3 + $0x24] sm:$0xf]  ;;  %v529_v29 = vld [vmem:[%s2346_s9 + $0x30] sm:$0xff]  ;;  %v532_v38 = vld [vmem:[%s2346_s9 + $0x48] sm:$0xff] }
  0x12   :  { %vm1359_vm15 = vmpackc.low %vm129_vm11, %vm128_vm10  ;;  %v62_v52 = vadd.s32 144, %v1635_v1  ;;  %v63_v53 = vadd.s32 152, %v1635_v1  ;;  %v60_v54 = vadd.s32 128, %v1635_v1  ;;  %v61_v55 = vadd.s32 136, %v1635_v1  ;;  %v898_v28 = vld [vmem:[%s2343_s6] sm:$0xff]  ;;  %v530_v47 = vld [vmem:[%s2346_s9 + $0x38] sm:$0xff] }
  0x13   :  { %1358 = vmatpush.bf16.msk.msra.mxu1 %vm1357_vm9, %v1567_v9  ;;  %vm125_vm9 = vcmp.eq.s32.totalorder %v49_v16, %v1657_v10  ;;  %vm1761_vm10 = vmpackc.low %vm79_vm4, %vm78_vm3  ;;  %vm147_vm3 = vcmp.eq.s32.totalorder %v71_v31, %v1657_v10  ;;  %v1300_v62 = vor.u32 %v1476_v61, %v1299_v60  ;;  %v1301_v16 = vld [vmem:[%s2340_s3 + $0x18] sm:$0xf0]  ;;  %v1482_v31 = vld [vmem:[%s2340_s3 + $0x44] sm:$0xf0] }
  0x14   :  { %1515 = vmatpush.bf16.msk.msra.mxu2 %vm1279_vm0, %v1567_v9  ;;  %1516 = vmatpush.bf16.msk.msra.mxu3 %vm1279_vm0, %v1567_v9  ;;  %vm1363_vm14 = vmpackc.low %vm125_vm9, %vm124_vm8  ;;  %vm144_vm9 = vcmp.eq.s32.totalorder %v68_v36, %v1657_v10  ;;  %v1304_v17 = vor.u32 %v1475_v15, %v1301_v16  ;;  %v1479_v34 = vld [vmem:[%s2340_s3 + $0x34] sm:$0xf]  ;;  %v1317_v35 = vld [vmem:[%s2340_s3 + $0x38] sm:$0xf0] }
  0x15   :  { %1280 = vmatpush.bf16.msk.msra.mxu0 %vm1279_vm0, %v1567_v9  ;;  %vm126_vm0 = vcmp.eq.s32.totalorder %v50_v13, %v1657_v10  ;;  %966 = vperm.xlu1 %1537, %v908_v46   ;;  %v526_v13 = vld [vmem:[%s2346_s9 + $0x18] sm:$0xff]  ;;  %v1320_v36 = vor.u32 %v1479_v34, %v1317_v35  ;;  %v1331_v39 = vld [vmem:[%s2340_s3 + $0x50] sm:$0xf]  ;;  %v1481_v42 = vld [vmem:[%s2340_s3 + $0x44] sm:$0xf] }
  0x16   :  { %vm1361_vm7 = vmpackc.low %vm127_vm1, %vm126_vm0  ;;  %vm123_vm0 = vcmp.eq.s32.totalorder %v47_v19, %v1657_v10  ;;  %981 = vperm.xlu0 %1536, %v911_v57   ;;  %v899_v19 = vld [vmem:[%s2343_s6 + $0x8] sm:$0xff]  ;;  %v1485_v57 = vld [vmem:[%s2340_s3 + $0x64] sm:$0xf] }
  0x17   :  { %1360 = vmatpush.bf16.msk.msra.mxu1 %vm1359_vm15, %v1567_v9  ;;  %vm122_vm15 = vcmp.eq.s32.totalorder %v46_v18, %v1657_v10  ;;  %v904_v18 = vld [vmem:[%s2343_s6 + $0x30] sm:$0xff]  ;;  %v1486_v46 = vld [vmem:[%s2340_s3 + $0x64] sm:$0xf0]  ;;  %v1349_v5 = vld [vmem:[%s2340_s3 + $0x78] sm:$0xf0] }
  0x18   :  { %1517 = vmatpush.bf16.msk.msra.mxu2 %vm1687_vm6, %v1567_v9  ;;  %1518 = vmatpush.bf16.msk.msra.mxu3 %vm1687_vm6, %v1567_v9  ;;  %vm1797_vm4 = vmpackc.low %vm123_vm0, %vm122_vm15  ;;  %vm140_vm15 = vcmp.eq.s32.totalorder %v64_v48, %v1657_v10  ;;  %vm141_vm0 = vcmp.eq.s32.totalorder %v65_v49, %v1657_v10  ;;  %v1483_v49 = vld [vmem:[%s2340_s3 + $0x54] sm:$0xf]  ;;  %v536_v16 = vld [vmem:[%s2346_s9 + $0x68] sm:$0xff] }
  0x19   :  { %1282 = vmatpush.bf16.msk.msra.mxu0 %vm1687_vm6, %v1567_v9  ;;  %vm151_vm6 = vcmp.eq.s32.totalorder %v75_v23, %v1657_v10  ;;  %971 = vperm.xlu2 %1538, %v909_v12   ;;  %v903_v23 = vld [vmem:[%s2343_s6 + $0x28] sm:$0xff]  ;;  %v533_v59 = vld [vmem:[%s2346_s9 + $0x50] sm:$0xff] }
  0x1a   :  { %vm1369_vm11 = vmpackc.low %vm151_vm6, %vm150_vm5  ;;  %vm120_vm5 = vcmp.eq.s32.totalorder %v1635_v1, %v1657_v10  ;;  %vm121_vm6 = vcmp.eq.s32.totalorder %v1710_v21, %v1657_v10  ;;  %v1473_v1 = vld [vmem:[%s2340_s3 + $0x4] sm:$0xf]  ;;  %v1480_v21 = vld [vmem:[%s2340_s3 + $0x34] sm:$0xf0] }
  0x1b   :  { %1362 = vmatpush.bf16.msk.msra.mxu1 %vm1361_vm7, %v1567_v9  ;;  %vm1367_vm8 = vmpackc.low %vm121_vm6, %vm120_vm5  ;;  %vm136_vm5 = vcmp.eq.s32.totalorder %v60_v54, %v1657_v10  ;;  %vm137_vm6 = vcmp.eq.s32.totalorder %v61_v55, %v1657_v10  ;;  %v1296_v4 = vor.u32 %v1473_v1, %v1293_v2  ;;  %v1316_v22 = vor.u32 %v1480_v21, %v1315_v20  ;;  %v1488_v54 = vld [vmem:[%s2340_s3 + $0x74] sm:$0xf0]  ;;  %v535_v55 = vld [vmem:[%s2346_s9 + $0x60] sm:$0xff] }
  0x1c   :  { %1519 = vmatpush.bf16.msk.msra.mxu2 %vm1705_vm12, %v1567_v9  ;;  %1520 = vmatpush.bf16.msk.msra.mxu3 %vm1705_vm12, %v1567_v9 }
  0x1d   :  { %1284 = vmatpush.bf16.msk.msra.mxu0 %vm1705_vm12, %v1567_v9  ;;  %vm148_vm12 = vcmp.eq.s32.totalorder %v72_v26, %v1657_v10  ;;  %961 = vperm.xlu1 %1537, %v907_v56   ;;  %v1309_v26 = vld [vmem:[%s2340_s3 + $0x28] sm:$0xf0] }
  0x1e   :  { %vm1790_vm1 = vmpackc.low %vm149_vm13, %vm148_vm12  ;;  %vm142_vm12 = vcmp.eq.s32.totalorder %v66_v43, %v1657_v10  ;;  %vm143_vm13 = vcmp.eq.s32.totalorder %v67_v44, %v1657_v10  ;;  %956 = vperm.xlu0 %1536, %v906_v0   ;;  %v1312_v27 = vor.u32 %v1477_v25, %v1309_v26  ;;  %v1325_v43 = vld [vmem:[%s2340_s3 + $0x48] sm:$0xf0]  ;;  %v537_v0 = vld [vmem:[%s2346_s9 + $0x70] sm:$0xff] }
  0x1f   :  { %1364 = vmatpush.bf16.msk.msra.mxu1 %vm1363_vm14, %v1567_v9  ;;  %vm1377_vm14 = vmpackc.low %vm143_vm13, %vm142_vm12  ;;  %v1328_v44 = vor.u32 %v1481_v42, %v1325_v43 }
  0x20   :  { %1521 = vmatpush.bf16.msk.msra.mxu2 %vm1728_vm2, %v1567_v9  ;;  %1522 = vmatpush.bf16.msk.msra.mxu3 %vm1728_vm2, %v1567_v9 }
  0x21   :  { %1286 = vmatpush.bf16.msk.msra.mxu0 %vm1728_vm2, %v1567_v9  ;;  %vm146_vm2 = vcmp.eq.s32.totalorder %v70_v30, %v1657_v10  ;;  %946 = vperm.xlu2 %1538, %v904_v18   ;;  %v1323_v30 = vld [vmem:[%s2340_s3 + $0x40] sm:$0xf] }
  0x22   :  { %vm1373_vm7 = vmpackc.low %vm147_vm3, %vm146_vm2  ;;  %vm138_vm2 = vcmp.eq.s32.totalorder %v62_v52, %v1657_v10  ;;  %vm139_vm3 = vcmp.eq.s32.totalorder %v63_v53, %v1657_v10  ;;  %v1347_v53 = vld [vmem:[%s2340_s3 + $0x70] sm:$0xf] }
  0x23   :  { %1366 = vmatpush.bf16.msk.msra.mxu1 %vm1797_vm4, %v1567_v9  ;;  %vm1381_vm4 = vmpackc.low %vm139_vm3, %vm138_vm2  ;;  %v1348_v56 = vor.u32 %v1488_v54, %v1347_v53 }
  0x24   :  { %1523 = vmatpush.bf16.msk.msra.mxu2 %vm1761_vm10, %v1567_v9  ;;  %1524 = vmatpush.bf16.msk.msra.mxu3 %vm1761_vm10, %v1567_v9 }
  0x25   :  { %1288 = vmatpush.bf16.msk.msra.mxu0 %vm1761_vm10, %v1567_v9  ;;  %vm145_vm10 = vcmp.eq.s32.totalorder %v69_v37, %v1657_v10  ;;  %936 = vperm.xlu1 %1537, %v902_v63   ;;  %v1478_v10 = vld [vmem:[%s2340_s3 + $0x24] sm:$0xf0]  ;;  %v531_v37 = vld [vmem:[%s2346_s9 + $0x40] sm:$0xff] }
  0x26   :  { %951 = vperm.xlu0 %1536, %v905_v7  }
  0x27   :  { %287 = vmatmul.bf16.vlgmr.msra.gmra.mxu2 %v1468_v32  ;;  %297 = vmatmul.bf16.vlgmr.msra.gmra.mxu3 %v1470_v33  ;;  %v1324_v32 = vor.u32 %v1482_v31, %v1323_v30  ;;  %v527_v33 = vld [vmem:[%s2346_s9 + $0x20] sm:$0xff] }
  0x28   :  { %1370 = vmatpush.bf16.msk.msrb.mxu2 %vm1369_vm11, %v1567_v9  ;;  %272 = vmatmul.bf16.vlgmr.msra.gmra.mxu0 %v1465_v40  ;;  %vm1375_vm11 = vmpackc.low %vm145_vm10, %vm144_vm9  ;;  %v1484_v40 = vld [vmem:[%s2340_s3 + $0x54] sm:$0xf0] }
  0x29   :  { %1368 = vmatpush.bf16.msk.msra.mxu1 %vm1367_vm8, %v1567_v9  ;;  %941 = vperm.xlu2 %1538, %v903_v23   ;;  %v1332_v41 = vor.u32 %v1484_v40, %v1331_v39 }
  0x2c   :  { %1372 = vmatpush.bf16.msk.msrb.mxu2 %vm1790_vm1, %v1567_v9  ;;  %417 = vmatmul.bf16.vlgmr.msra.gmra.mxu1 %v1292_v45  ;;  %vm1379_vm1 = vmpackc.low %vm141_vm0, %vm140_vm15  ;;  %v1339_v45 = vld [vmem:[%s2340_s3 + $0x60] sm:$0xf] }
  0x2d   :  { %931 = vperm.xlu1 %1537, %v901_v6   ;;  %v1340_v48 = vor.u32 %v1486_v46, %v1339_v45 }
  0x2e   :  { %926 = vperm.xlu0 %1536, %v900_v14  }
  0x30   :  { %1374 = vmatpush.bf16.msk.msrb.mxu2 %vm1373_vm7, %v1567_v9  ;;  %vm1383_vm7 = vmpackc.low %vm137_vm6, %vm136_vm5 }
  0x31   :  { %916 = vperm.xlu2 %1538, %v898_v28  }
  0x34   :  { %1376 = vmatpush.bf16.msk.msrb.mxu2 %vm1375_vm11, %v1567_v9 }
  0x35   :  { %556 = vperm.xlu1 %1537, %v526_v13  }
  0x36   :  { %921 = vperm.xlu0 %1536, %v899_v19  }
  0x37   :  { %292 = vmatmul.bf16.gmra.mxu2 %v1469_v50  ;;  %302 = vmatmul.bf16.gmra.mxu3 %v1471_v51  ;;  %v1333_v50 = vld [vmem:[%s2340_s3 + $0x58] sm:$0xf0] }
  0x38   :  { %1378 = vmatpush.bf16.msk.msrb.mxu2 %vm1377_vm14, %v1567_v9  ;;  %277 = vmatmul.bf16.gmra.mxu0 %v1466_v58  ;;  %v534_v51 = vld [vmem:[%s2346_s9 + $0x58] sm:$0xff]  ;;  %v1336_v52 = vor.u32 %v1483_v49, %v1333_v50  ;;  %v1341_v58 = vld [vmem:[%s2340_s3 + $0x68] sm:$0xf0] }
  0x39   :  { %561 = vperm.xlu2 %1538, %v527_v33   ;;  %v1344_v60 = vor.u32 %v1485_v57, %v1341_v58 }
  0x3c   :  { %1380 = vmatpush.bf16.msk.msrb.mxu2 %vm1379_vm1, %v1567_v9  ;;  %422 = vmatmul.bf16.gmra.mxu1 %v1300_v62 }
  0x3d   :  { %571 = vperm.xlu1 %1537, %v529_v29  }
  0x3e   :  { %566 = vperm.xlu0 %1536, %v528_v24  }
  0x40   :  { %1382 = vmatpush.bf16.msk.msrb.mxu2 %vm1381_vm4, %v1567_v9 }
  0x41   :  { %576 = vperm.xlu2 %1538, %v530_v47  }
  0x44   :  { %1384 = vmatpush.bf16.msk.msrb.mxu2 %vm1383_vm7, %v1567_v9  ;;  %v1307_v9 = vld [vmem:[%s2340_s3 + $0x20] sm:$0xf] }
  0x45   :  { %v1308_v11 = vor.u32 %v1478_v10, %v1307_v9  ;;  %586 = vperm.xlu1 %1537, %v532_v38   ;;  %v538_v10 = vld [vmem:[%s2346_s9 + $0x78] sm:$0xff]  ;;  %s1232_s9 = sshll.u32 %s2349_s12, 4  ;;  %s1233_s9 = int_to_ptr.hbm [resolvable:$true] %s1232_s9 }
  0x46   :  { %581 = vperm.xlu0 %1536, %v531_v37  }
  0x47   :  { %307 = vmatmul.bf16.gmra.mxu3 %v1472_v3  ;;  %466 = vmatmul.bf16.vlgmr.msrb.gmra.mxu2 %v1296_v4  ;;  %v1487_v4 = vld [vmem:[%s2340_s3 + $0x74] sm:$0xf] }
  0x48   :  { %282 = vmatmul.bf16.gmra.mxu0 %v1467_v8  ;;  %v1352_v9 = vor.u32 %v1487_v4, %v1349_v5 }
  0x49   :  { %591 = vperm.xlu2 %1538, %v533_v59  }
  0x4c   :  { %427 = vmatmul.bf16.gmra.mxu1 %v1308_v11 }
  0x4d   :  { %601 = vperm.xlu1 %1537, %v535_v55  }
  0x4e   :  { %596 = vperm.xlu0 %1536, %v534_v51  }
  0x51   :  { %606 = vperm.xlu2 %1538, %v536_v16  }
  0x55   :  { %616 = vperm.xlu1 %1537, %v538_v10  }
  0x56   :  { %611 = vperm.xlu0 %1536, %v537_v0  }
  0x57   :  { %471 = vmatmul.bf16.gmra.mxu2 %v1304_v17 }
  0x5c   :  { %432 = vmatmul.bf16.gmra.mxu1 %v1316_v22 }
  0x63   :  { %v2046_v3 = vpop.permute.xlu2 %991 }
  0x67   :  { %476 = vmatmul.bf16.gmra.mxu2 %v1312_v27 }
  0x6b   :  { %v2063_v13 = vpop.permute.xlu2 %976 }
  0x6c   :  { %437 = vmatmul.bf16.gmra.mxu1 %v1324_v32 }
  0x73   :  { %v2082_v23 = vpop.permute.xlu2 %971 }
  0x76   :  { %v2037_v61 = vpop.permute.xlu1 %551 }
  0x77   :  { %481 = vmatmul.bf16.gmra.mxu2 %v1320_v36  ;;  %v542_v1 = vpop.permute.xlu0 %541 }
  0x7b   :  { %v2096_v32 = vpop.permute.xlu2 %946 }
  0x7c   :  { %442 = vmatmul.bf16.gmra.mxu1 %v1332_v41 }
  0x7f   :  { %v2054_v6 = vpop.permute.xlu1 %986 }
  0x80   :  { %v547_v12 = vpop.permute.xlu0 %546 }
  0x83   :  { %v2116_v46 = vpop.permute.xlu2 %941 }
  0x87   :  { %486 = vmatmul.bf16.gmra.mxu2 %v1328_v44  ;;  %v2072_v17 = vpop.permute.xlu1 %966 }
  0x88   :  { %v2076_v20 = vpop.permute.xlu0 %981 }
  0x8c   :  { %447 = vmatmul.bf16.gmra.mxu1 %v1340_v48 }
  0x8f   :  { %v2084_v24 = vpop.permute.xlu1 %961 }
  0x90   :  { %v2092_v30 = vpop.permute.xlu0 %956 }
  0x97   :  { %491 = vmatmul.bf16.gmra.mxu2 %v1336_v52  ;;  %v2098_v34 = vpop.permute.xlu1 %936 }
  0x98   :  { %v2114_v44 = vpop.permute.xlu0 %951 }
  0x9c   :  { %452 = vmatmul.bf16.gmra.mxu1 %v1348_v56 }
  0x9f   :  { %v2120_v50 = vpop.permute.xlu1 %931 }
  0xa0   :  { %v2131_v57 = vpop.permute.xlu0 %926 }
  0xa5   :  { %v2074_v18 = vpop.f32.mrf.mxu0 }
  0xa7   :  { %496 = vmatmul.bf16.gmra.mxu2 %v1344_v60  ;;  %v2133_v60 = vpop.permute.xlu2 %916 }
  0xa8   :  { %v2143_v16 = vpop.permute.xlu0 %921 }
  0xa9   :  { %v418_v2 = vpop.f32.mrf.mxu1 }
  0xaa   :  { %v2039_v62 = vpop.f32.mrf.mxu2  ;;  %v2041_v63 = vpop.f32.mrf.mxu3 }
  0xad   :  { %v2086_v25 = vpop.f32.mrf.mxu0 }
  0xb1   :  { %v420_v11 = vpop.f32.mrf.mxu1 }
  0xb2   :  { %v2056_v7 = vpop.f32.mrf.mxu2  ;;  %v2058_v8 = vpop.f32.mrf.mxu3 }
  0xb3   :  { %v677_v48 = vpack.c.bf16 %v2058_v8, %v2041_v63 }
  0xb5   :  { %v2106_v39 = vpop.f32.mrf.mxu0 }
  0xb7   :  { %501 = vmatmul.bf16.gmra.mxu2 %v1352_v9 }
  0xb9   :  { %v423_v19 = vpop.f32.mrf.mxu1 }
  0xba   :  { %v2065_v14 = vpop.f32.mrf.mxu2  ;;  %v2067_v15 = vpop.f32.mrf.mxu3 }
  0xbd   :  { %v2126_v53 = vpop.f32.mrf.mxu0 }
  0xc1   :  { %v425_v26 = vpop.f32.mrf.mxu1 }
  0xc2   :  { %v2078_v21 = vpop.f32.mrf.mxu2  ;;  %v2080_v22 = vpop.f32.mrf.mxu3 }
  0xc3   :  { %v678_v42 = vpack.c.bf16 %v2080_v22, %v2067_v15  ;;  %v676_v56 = vpack.c.bf16 %v2078_v21, %v2065_v14 }
  0xc5   :  { %v283_v9 = vpop.f32.mrf.mxu0 }
  0xc9   :  { %v428_v40 = vpop.f32.mrf.mxu1 }
  0xca   :  { %v2088_v27 = vpop.f32.mrf.mxu3  ;;  %v467_v28 = vpop.f32.mrf.mxu2 }
  0xcb   :  { %v2090_v29 = vadd.f32 %v467_v28, %v418_v2  ;;  %v557_v2 = vpop.permute.xlu1 %556 }
  0xcd   :  { %v507_v31 = vmul.f32 %v2090_v29, %v2074_v18 }
  0xcf   :  { %v619_v33 = vmul.f32 %v542_v1, %v507_v31  ;;  %v675_v1 = vpack.c.bf16 %v2056_v7, %v2039_v62 }
  0xd1   :  { %v430_v54 = vpop.f32.mrf.mxu1 }
  0xd2   :  { %v2100_v35 = vpop.f32.mrf.mxu3  ;;  %v469_v36 = vpop.f32.mrf.mxu2 }
  0xd3   :  { %v2102_v37 = vadd.f32 %v469_v36, %v420_v11  ;;  %v679_v38 = vpack.c.bf16 %v2100_v35, %v2088_v27  ;;  %v285_v36 = vpop.f32.mrf.mxu0 }
  0xd5   :  { %v508_v41 = vmul.f32 %v2102_v37, %v2086_v25  ;;  %849 = vmatpush.bf16.msrb.mxu0 %v679_v38  ;;  %v696_v43 = vpack.c.bf16 %v2102_v37, %v2090_v29  ;;  %v1499_v29 = vld [vmem:[%s2342_s5 + $0x10] sm:$0xff]  ;;  %v1494_v37 = vld [vmem:[%s2341_s4 + $0x28] sm:$0xff] }
  0xd7   :  { %v620_v45 = vmul.f32 %v547_v12, %v508_v41 }
  0xd9   :  { %v635_v47 = vadd.f32 %v620_v45, %v619_v33  ;;  %850 = vmatpush.bf16.msrb.mxu0 %v678_v42  ;;  %v433_v10 = vpop.f32.mrf.mxu1  ;;  %v567_v45 = vpop.permute.xlu0 %566 }
  0xda   :  { %v472_v49 = vpop.f32.mrf.mxu2 }
  0xdb   :  { %v2122_v51 = vadd.f32 %v472_v49, %v423_v19 }
  0xdd   :  { %v509_v52 = vmul.f32 %v2122_v51, %v2106_v39  ;;  %851 = vmatpush.bf16.msrb.mxu0 %v677_v48 }
  0xdf   :  { %v621_v55 = vmul.f32 %v2037_v61, %v509_v52 }
  0xe1   :  { %852 = vmatpush.bf16.msrb.mxu0 %v676_v56  ;;  %v636_v58 = vadd.f32 %v635_v47, %v621_v55  ;;  %v435_v41 = vpop.f32.mrf.mxu1  ;;  %v572_v56 = vpop.permute.xlu1 %571 }
  0xe2   :  { %v474_v59 = vpop.f32.mrf.mxu2 }
  0xe3   :  { %v2135_v0 = vadd.f32 %v474_v59, %v425_v26  ;;  %v562_v26 = vpop.permute.xlu2 %561 }
  0xe5   :  { %v510_v4 = vmul.f32 %v2135_v0, %v2126_v53  ;;  %853 = vmatpush.bf16.msrb.mxu0 %v675_v1  ;;  %v697_v61 = vpack.c.bf16 %v2135_v0, %v2122_v51  ;;  %v1498_v51 = vld [vmem:[%s2342_s5 + $0x8] sm:$0xff]  ;;  %v1493_v0 = vld [vmem:[%s2341_s4 + $0x20] sm:$0xff] }
  0xe7   :  { %v622_v5 = vmul.f32 %v557_v2, %v510_v4 }
  0xe9   :  { %v637_v11 = vadd.f32 %v636_v58, %v622_v5  ;;  %v438_v58 = vpop.f32.mrf.mxu1 }
  0xea   :  { %v477_v12 = vpop.f32.mrf.mxu2 }
  0xeb   :  { %v2145_v19 = vadd.f32 %v477_v12, %v428_v40  ;;  %v577_v5 = vpop.permute.xlu2 %576 }
  0xed   :  { %v511_v28 = vmul.f32 %v2145_v19, %v283_v9 }
  0xef   :  { %v623_v31 = vmul.f32 %v562_v26, %v511_v28 }
  0xf1   :  { %v638_v33 = vadd.f32 %v637_v11, %v623_v31  ;;  %v440_v26 = vpop.f32.mrf.mxu1 }
  0xf2   :  { %v479_v38 = vpop.f32.mrf.mxu2 }
  0xf3   :  { %v2148_v42 = vadd.f32 %v479_v38, %v430_v54  ;;  %v582_v38 = vpop.permute.xlu0 %581 }
  0xf5   :  { %v512_v47 = vmul.f32 %v2148_v42, %v285_v36  ;;  %v698_v48 = vpack.c.bf16 %v2148_v42, %v2145_v19  ;;  %v1492_v19 = vld [vmem:[%s2341_s4 + $0x18] sm:$0xff]  ;;  %v1495_v42 = vld [vmem:[%s2341_s4 + $0x30] sm:$0xff] }
  0xf7   :  { %v624_v49 = vmul.f32 %v567_v45, %v512_v47 }
  0xf9   :  { %v639_v52 = vadd.f32 %v638_v33, %v624_v49  ;;  %v443_v47 = vpop.f32.mrf.mxu1 }
  0xfa   :  { %v482_v40 = vpop.f32.mrf.mxu2 }
  0xfb   :  { %v2153_v55 = vadd.f32 %v482_v40, %v433_v10  ;;  %v673_v40 = vpack.c.bf16 %v2126_v53, %v2106_v39 }
  0xfd   :  { %v513_v59 = vmul.f32 %v2153_v55, %v2039_v62 }
  0xff   :  { %v625_v1 = vmul.f32 %v572_v56, %v513_v59  ;;  %v587_v56 = vpop.permute.xlu1 %586 }
 0x101   :  { %v640_v2 = vadd.f32 %v639_v52, %v625_v1  ;;  %v672_v1 = vpack.c.bf16 %v2086_v25, %v2074_v18 }
 0x102   :  { %v484_v54 = vpop.f32.mrf.mxu2 }
 0x103   :  { %v2157_v4 = vadd.f32 %v484_v54, %v435_v41  ;;  %v674_v41 = vpack.c.bf16 %v285_v36, %v283_v9  ;;  %v592_v54 = vpop.permute.xlu2 %591 }
 0x105   :  { %v514_v11 = vmul.f32 %v2157_v4, %v2056_v7  ;;  %v699_v12 = vpack.c.bf16 %v2157_v4, %v2153_v55  ;;  %854 = vmatpush.bf16.msrb.mxu0 %v674_v41  ;;  %v1501_v55 = vld [vmem:[%s2342_s5 + $0x20] sm:$0xff] }
 0x106   :  { %v1151_v4 = vld [vmem:[%s2347_s10] sm:$0xff] }
 0x107   :  { %v626_v10 = vmul.f32 %v577_v5, %v514_v11  ;;  %v602_v25 = vpop.permute.xlu1 %601 }
 0x109   :  { %v641_v28 = vadd.f32 %v640_v2, %v626_v10  ;;  %855 = vmatpush.bf16.msrb.mxu0 %v673_v40 }
 0x10a   :  { %v487_v31 = vpop.f32.mrf.mxu2 }
 0x10b   :  { %v2163_v33 = vadd.f32 %v487_v31, %v438_v58  ;;  %v607_v40 = vpop.permute.xlu2 %606 }
 0x10d   :  { %v515_v62 = vmul.f32 %v2163_v33, %v2065_v14  ;;  %856 = vmatpush.bf16.msrb.mxu0 %v672_v1  ;;  %v445_v14 = vpop.f32.mrf.mxu1 }
 0x10f   :  { %v627_v45 = vmul.f32 %v582_v38, %v515_v62 }
 0x111   :  { %v642_v49 = vadd.f32 %v641_v28, %v627_v45  ;;  %v597_v28 = vpop.permute.xlu0 %596 }
 0x112   :  { %v489_v52 = vpop.f32.mrf.mxu2 }
 0x113   :  { %v490_v7 = vadd.f32 %v489_v52, %v440_v26 }
 0x115   :  { %v516_v59 = vmul.f32 %v490_v7, %v2078_v21  ;;  %v448_v53 = vpop.f32.mrf.mxu1 }
 0x117   :  { %v628_v58 = vmul.f32 %v587_v56, %v516_v59 }
 0x119   :  { %v643_v2 = vadd.f32 %v642_v49, %v628_v58 }
 0x11a   :  { %v492_v9 = vpop.f32.mrf.mxu2 }
 0x11b   :  { %v493_v36 = vadd.f32 %v492_v9, %v443_v47 }
 0x11d   :  { %v517_v5 = vmul.f32 %v493_v36, %v2041_v63  ;;  %v450_v41 = vpop.f32.mrf.mxu1 }
 0x11f   :  { %v629_v11 = vmul.f32 %v592_v54, %v517_v5 }
 0x121   :  { %v644_v26 = vadd.f32 %v643_v2, %v629_v11 }
 0x122   :  { %v494_v10 = vpop.f32.mrf.mxu2 }
 0x123   :  { %v495_v39 = vadd.f32 %v494_v10, %v445_v14  ;;  %v612_v14 = vpop.permute.xlu0 %611 }
 0x125   :  { %v518_v21 = vmul.f32 %v495_v39, %v2058_v8  ;;  %v453_v58 = vpop.f32.mrf.mxu1 }
 0x127   :  { %v630_v31 = vmul.f32 %v597_v28, %v518_v21 }
 0x129   :  { %v645_v38 = vadd.f32 %v644_v26, %v630_v31  ;;  %v1489_v26 = vld [vmem:[%s2341_s4] sm:$0xff] }
 0x12a   :  { %v497_v62 = vpop.f32.mrf.mxu2  ;;  %857 = vmatmul.bf16.vlgmr.msrb.gmra.mxu0 %v1489_v26 }
 0x12b   :  { %v498_v18 = vadd.f32 %v497_v62, %v448_v53  ;;  %v617_v53 = vpop.permute.xlu1 %616  ;;  %v1490_v62 = vld [vmem:[%s2341_s4 + $0x8] sm:$0xff] }
 0x12d   :  { %v519_v45 = vmul.f32 %v498_v18, %v2067_v15  ;;  %v455_v11 = vpop.f32.mrf.mxu1 }
 0x12f   :  { %v631_v47 = vmul.f32 %v602_v25, %v519_v45  ;;  %v700_v25 = vpack.c.bf16 %v490_v7, %v2163_v33  ;;  %v1497_v33 = vld [vmem:[%s2342_s5] sm:$0xff]  ;;  %v1153_v7 = vld [vmem:[%s2347_s10 + $0x10] sm:$0xff] }
 0x130   :  { %v1042_v45 = vld [vmem:[%s2345_s8] sm:$0xff] }
 0x131   :  { %v646_v49 = vadd.f32 %v645_v38, %v631_v47  ;;  %1052 = vperm.xlu2 %1538, %v1042_v45   ;;  %v1155_v47 = vld [vmem:[%s2347_s10 + $0x20] sm:$0xff] }
 0x132   :  { %v499_v52 = vpop.f32.mrf.mxu2 }
 0x133   :  { %v500_v63 = vadd.f32 %v499_v52, %v450_v41  ;;  %v1048_v41 = vld [vmem:[%s2345_s8 + $0x30] sm:$0xff]  ;;  %v1156_v52 = vld [vmem:[%s2347_s10 + $0x28] sm:$0xff] }
 0x135   :  { %v520_v56 = vmul.f32 %v500_v63, %v2080_v22  ;;  %v702_v38 = vpack.c.bf16 %v500_v63, %v498_v18  ;;  %v1502_v18 = vld [vmem:[%s2342_s5 + $0x28] sm:$0xff]  ;;  %v1157_v63 = vld [vmem:[%s2347_s10 + $0x30] sm:$0xff] }
 0x137   :  { %v632_v59 = vmul.f32 %v607_v40, %v520_v56  ;;  %v1503_v40 = vld [vmem:[%s2342_s5 + $0x30] sm:$0xff]  ;;  %v1046_v56 = vld [vmem:[%s2345_s8 + $0x20] sm:$0xff] }
 0x139   :  { %v647_v1 = vadd.f32 %v646_v49, %v632_v59  ;;  %v1045_v49 = vld [vmem:[%s2345_s8 + $0x18] sm:$0xff] }
 0x13a   :  { %v502_v2 = vpop.f32.mrf.mxu2  ;;  %862 = vmatmul.bf16.gmra.mxu0 %v1490_v62  ;;  %1067 = vperm.xlu2 %1538, %v1045_v49  }
 0x13b   :  { %v503_v8 = vadd.f32 %v502_v2, %v453_v58  ;;  %v1154_v58 = vld [vmem:[%s2347_s10 + $0x18] sm:$0xff] }
 0x13c   :  { %v1049_v2 = vld [vmem:[%s2345_s8 + $0x38] sm:$0xff] }
 0x13d   :  { %v521_v9 = vmul.f32 %v503_v8, %v2088_v27  ;;  %v701_v27 = vpack.c.bf16 %v495_v39, %v493_v36  ;;  %v1496_v36 = vld [vmem:[%s2341_s4 + $0x38] sm:$0xff]  ;;  %v1047_v39 = vld [vmem:[%s2345_s8 + $0x28] sm:$0xff] }
 0x13f   :  { %v633_v54 = vmul.f32 %v612_v14, %v521_v9  ;;  %v1158_v14 = vld [vmem:[%s2347_s10 + $0x38] sm:$0xff] }
 0x141   :  { %v648_v5 = vadd.f32 %v647_v1, %v633_v54  ;;  %v1504_v1 = vld [vmem:[%s2342_s5 + $0x38] sm:$0xff] }
 0x142   :  { %v504_v15 = vpop.f32.mrf.mxu2  ;;  %1072 = vperm.xlu2 %1538, %v1046_v56  }
 0x143   :  { %v505_v10 = vadd.f32 %v504_v15, %v455_v11 }
 0x145   :  { %v522_v22 = vmul.f32 %v505_v10, %v2100_v35  ;;  %v703_v28 = vpack.c.bf16 %v505_v10, %v503_v8  ;;  %v1491_v35 = vld [vmem:[%s2341_s4 + $0x10] sm:$0xff] }
 0x147   :  { %v634_v21 = vmul.f32 %v617_v53, %v522_v22  ;;  %752 = vmatpush.bf16.msrb.mxu3 %v703_v28 }
 0x149   :  { %v2181_v31 = vadd.f32 %v648_v5, %v634_v21 }
 0x14a   :  { %867 = vmatmul.bf16.gmra.mxu0 %v1491_v35  ;;  %1176 = vperm.xlu2 %1538, %v1154_v58  }
 0x14b   :  { %753 = vmatpush.bf16.msrb.mxu3 %v702_v38 }
 0x14f   :  { %754 = vmatpush.bf16.msrb.mxu3 %v701_v27 }
 0x152   :  { %1087 = vperm.xlu2 %1538, %v1049_v2  }
 0x153   :  { %755 = vmatpush.bf16.msrb.mxu3 %v700_v25 }
 0x157   :  { %756 = vmatpush.bf16.msrb.mxu3 %v699_v12  ;;  %v1152_v12 = vld [vmem:[%s2347_s10 + $0x8] sm:$0xff] }
 0x15a   :  { %872 = vmatmul.bf16.gmra.mxu0 %v1492_v19  ;;  %1196 = vperm.xlu2 %1538, %v1158_v14  }
 0x15b   :  { %757 = vmatpush.bf16.msrb.mxu3 %v698_v48  ;;  %v1044_v48 = vld [vmem:[%s2345_s8 + $0x10] sm:$0xff] }
 0x15c   :  { %1062 = vperm.xlu1 %1537, %v1044_v48  }
 0x15f   :  { %758 = vmatpush.bf16.msrb.mxu3 %v697_v61  ;;  %v1043_v61 = vld [vmem:[%s2345_s8 + $0x8] sm:$0xff] }
 0x160   :  { %1057 = vperm.xlu0 %1536, %v1043_v61  }
 0x163   :  { %759 = vmatpush.bf16.msrb.mxu3 %v696_v43  ;;  %v1500_v43 = vld [vmem:[%s2342_s5 + $0x18] sm:$0xff] }
 0x164   :  { %1166 = vperm.xlu1 %1537, %v1152_v12  }
 0x166   :  { %760 = vmatmul.bf16.vlgmr.msrb.gmra.mxu3 %v1497_v33 }
 0x168   :  { %1161 = vperm.xlu0 %1536, %v1151_v4  }
 0x16a   :  { %877 = vmatmul.bf16.gmra.mxu0 %v1493_v0 }
 0x16c   :  { %1077 = vperm.xlu1 %1537, %v1047_v39  }
 0x170   :  { %1171 = vperm.xlu0 %1536, %v1153_v7  }
 0x174   :  { %1181 = vperm.xlu1 %1537, %v1155_v47  }
 0x176   :  { %765 = vmatmul.bf16.gmra.mxu3 %v1498_v51 }
 0x178   :  { %1082 = vperm.xlu0 %1536, %v1048_v41  }
 0x17a   :  { %882 = vmatmul.bf16.gmra.mxu0 %v1494_v37 }
 0x17c   :  { %1191 = vperm.xlu1 %1537, %v1157_v63  }
 0x180   :  { %1186 = vperm.xlu0 %1536, %v1156_v52  }
 0x186   :  { %770 = vmatmul.bf16.gmra.mxu3 %v1499_v29 }
 0x18a   :  { %887 = vmatmul.bf16.gmra.mxu0 %v1495_v42 }
 0x196   :  { %775 = vmatmul.bf16.gmra.mxu3 %v1500_v43 }
 0x19a   :  { %892 = vmatmul.bf16.gmra.mxu0 %v1496_v36 }
 0x1a6   :  { %780 = vmatmul.bf16.gmra.mxu3 %v1501_v55 }
 0x1a7   :  { %v858_v59 = vpop.f32.mrf.mxu0 }
 0x1af   :  { %v860_v8 = vpop.f32.mrf.mxu0 }
 0x1b6   :  { %785 = vmatmul.bf16.gmra.mxu3 %v1502_v18 }
 0x1b7   :  { %v863_v9 = vpop.f32.mrf.mxu0 }
 0x1bf   :  { %v865_v5 = vpop.f32.mrf.mxu0 }
 0x1c6   :  { %790 = vmatmul.bf16.gmra.mxu3 %v1503_v40 }
 0x1c7   :  { %v868_v53 = vpop.f32.mrf.mxu0 }
 0x1cf   :  { %v870_v25 = vpop.f32.mrf.mxu0 }
 0x1d6   :  { %795 = vmatmul.bf16.gmra.mxu3 %v1504_v1 }
 0x1e9   :  { %v761_v54 = vpop.f32.mrf.mxu3 }
 0x1ea   :  { %v859_v11 = vadd.f32 %v858_v59, %v761_v54 }
 0x1ec   :  { %v994_v26 = vadd.f32 %v2133_v60, %v859_v11  ;;  %v873_v60 = vpop.f32.mrf.mxu0 }
 0x1ee   :  { %v1010_v28 = vmax.f32 %v994_v26, 0.0 }
 0x1f1   :  { %v763_v15 = vpop.f32.mrf.mxu3 }
 0x1f2   :  { %v861_v10 = vadd.f32 %v860_v8, %v763_v15 }
 0x1f4   :  { %v995_v22 = vadd.f32 %v2143_v16, %v861_v10  ;;  %v875_v42 = vpop.f32.mrf.mxu0 }
 0x1f6   :  { %v1011_v21 = vmax.f32 %v995_v22, 0.0 }
 0x1f8   :  { %v2291_v38 = vpack.c.bf16 %v1011_v21, %v1010_v28 }
 0x1f9   :  { %v766_v27 = vpop.f32.mrf.mxu3 }
 0x1fa   :  { %v864_v62 = vadd.f32 %v863_v9, %v766_v27 }
 0x1fc   :  { %v996_v33 = vadd.f32 %v2131_v57, %v864_v62  ;;  %v878_v39 = vpop.f32.mrf.mxu0 }
 0x1fe   :  { %v1012_v0 = vmax.f32 %v996_v33, 0.0 }
 0x201   :  { %v768_v35 = vpop.f32.mrf.mxu3 }
 0x202   :  { %v866_v19 = vadd.f32 %v865_v5, %v768_v35 }
 0x204   :  { %v997_v51 = vadd.f32 %v2120_v50, %v866_v19  ;;  %v880_v49 = vpop.f32.mrf.mxu0 }
 0x206   :  { %v1013_v29 = vmax.f32 %v997_v51, 0.0 }
 0x208   :  { %v2295_v37 = vpack.c.bf16 %v1013_v29, %v1012_v0 }
 0x209   :  { %v771_v43 = vpop.f32.mrf.mxu3 }
 0x20a   :  { %v869_v16 = vadd.f32 %v868_v53, %v771_v43 }
 0x20c   :  { %v998_v48 = vadd.f32 %v2098_v34, %v869_v16 }
 0x20e   :  { %v1014_v12 = vmax.f32 %v998_v48, 0.0 }
 0x211   :  { %v773_v61 = vpop.f32.mrf.mxu3 }
 0x212   :  { %v871_v55 = vadd.f32 %v870_v25, %v773_v61 }
 0x214   :  { %v999_v4 = vadd.f32 %v2116_v46, %v871_v55  ;;  %v883_v46 = vpop.f32.mrf.mxu0  ;;  %v1053_v55 = vpop.permute.xlu2 %1052 }
 0x216   :  { %v1015_v7 = vmax.f32 %v999_v4, 0.0 }
 0x218   :  { %v2299_v57 = vpack.c.bf16 %v1015_v7, %v1014_v12  ;;  %v1058_v12 = vpop.permute.xlu0 %1057  ;;  %v1063_v7 = vpop.permute.xlu1 %1062 }
 0x219   :  { %v776_v36 = vpop.f32.mrf.mxu3 }
 0x21a   :  { %v874_v50 = vadd.f32 %v873_v60, %v776_v36 }
 0x21c   :  { %v1000_v45 = vadd.f32 %v2096_v32, %v874_v50  ;;  %v885_v1 = vpop.f32.mrf.mxu0 }
 0x21e   :  { %v1016_v52 = vmax.f32 %v1000_v45, 0.0 }
 0x220   :  { %v1162_v50 = vpop.permute.xlu0 %1161 }
 0x221   :  { %v778_v18 = vpop.f32.mrf.mxu3 }
 0x222   :  { %v876_v41 = vadd.f32 %v875_v42, %v778_v18 }
 0x224   :  { %v1001_v47 = vadd.f32 %v2114_v44, %v876_v41  ;;  %v888_v8 = vpop.f32.mrf.mxu0 }
 0x226   :  { %v1017_v63 = vmax.f32 %v1001_v47, 0.0 }
 0x228   :  { %v1037_v34 = vpack.c.bf16 %v1017_v63, %v1016_v52  ;;  %v1172_v45 = vpop.permute.xlu0 %1171 }
 0x229   :  { %v781_v40 = vpop.f32.mrf.mxu3 }
 0x22a   :  { %v879_v56 = vadd.f32 %v878_v39, %v781_v40 }
 0x22c   :  { %v890_v9 = vpop.f32.mrf.mxu0 }
 0x231   :  { %v783_v59 = vpop.f32.mrf.mxu3 }
 0x232   :  { %v881_v19 = vadd.f32 %v880_v49, %v783_v59 }
 0x234   :  { %v893_v5 = vpop.f32.mrf.mxu0 }
 0x239   :  { %v786_v58 = vpop.f32.mrf.mxu3 }
 0x23a   :  { %v884_v62 = vadd.f32 %v883_v46, %v786_v58 }
 0x23c   :  { %v895_v44 = vpop.f32.mrf.mxu0  ;;  %v1004_v60 = vadd.f32 %v2072_v17, %v884_v62  ;;  %v1505_v17 = vld [vmem:[%s2344_s7] sm:$0xff] }
 0x23e   :  { %v1020_v61 = vmax.f32 %v1004_v60, 0.0 }
 0x241   :  { %v788_v2 = vpop.f32.mrf.mxu3 }
 0x242   :  { %v886_v28 = vadd.f32 %v885_v1, %v788_v2 }
 0x244   :  { %v1005_v51 = vadd.f32 %v2082_v23, %v886_v28 }
 0x249   :  { %v791_v14 = vpop.f32.mrf.mxu3 }
 0x24a   :  { %v889_v10 = vadd.f32 %v888_v8, %v791_v14  ;;  %v1083_v8 = vpop.permute.xlu0 %1082 }
 0x24c   :  { %v1006_v25 = vadd.f32 %v2063_v13, %v889_v10 }
 0x24e   :  { %v1022_v43 = vmax.f32 %v1006_v25, 0.0  ;;  %v650_v25 = vrot.slane %v2181_v31, 4 }
 0x251   :  { %v793_v54 = vpop.f32.mrf.mxu3 }
 0x252   :  { %v891_v15 = vadd.f32 %v890_v9, %v793_v54 }
 0x254   :  { %v1007_v21 = vadd.f32 %v2076_v20, %v891_v15  ;;  %v1021_v20 = vmax.f32 %v1005_v51, 0.0  ;;  %v1187_v51 = vpop.permute.xlu0 %1186 }
 0x256   :  { %v1023_v0 = vmax.f32 %v1007_v21, 0.0  ;;  %v1039_v42 = vpack.c.bf16 %v1021_v20, %v1020_v61 }
 0x258   :  { %v1040_v16 = vpack.c.bf16 %v1023_v0, %v1022_v43 }
 0x259   :  { %v796_v32 = vpop.f32.mrf.mxu3 }
 0x25a   :  { %v894_v11 = vadd.f32 %v893_v5, %v796_v32 }
 0x25c   :  { %v1008_v53 = vadd.f32 %v2054_v6, %v894_v11  ;;  %v1003_v6 = vadd.f32 %v2084_v24, %v881_v19  ;;  %v1508_v24 = vld [vmem:[%s2344_s7 + $0x18] sm:$0xff] }
 0x25e   :  { %v1024_v35 = vmax.f32 %v1008_v53, 0.0  ;;  %v1019_v13 = vmax.f32 %v1003_v6, 0.0  ;;  %v651_v6 = vadd.f32 %v650_v25, %v2181_v31  ;;  %v1222_v31 = vstv %s2348_s11 }
 0x261   :  { %v798_v26 = vpop.f32.mrf.mxu3 }
 0x262   :  { %v896_v22 = vadd.f32 %v895_v44, %v798_v26 }
 0x264   :  { %v1009_v27 = vadd.f32 %v2046_v3, %v896_v22  ;;  %v1002_v3 = vadd.f32 %v2092_v30, %v879_v56  ;;  %v1506_v30 = vld [vmem:[%s2344_s7 + $0x8] sm:$0xff] }
 0x266   :  { %v1025_v33 = vmax.f32 %v1009_v27, 0.0  ;;  %v1018_v48 = vmax.f32 %v1002_v3, 0.0 }
 0x268   :  { %v1041_v29 = vpack.c.bf16 %v1025_v33, %v1024_v35  ;;  %v1038_v23 = vpack.c.bf16 %v1019_v13, %v1018_v48 }
 0x26a   :  { %1114 = vmatpush.bf16.msrb.mxu1 %v1041_v29  ;;  %1525 = vmatpush.bf16.msra.mxu2 %v1041_v29 }
 0x26e   :  { %1115 = vmatpush.bf16.msrb.mxu1 %v1040_v16  ;;  %1526 = vmatpush.bf16.msra.mxu2 %v1040_v16 }
 0x272   :  { %1116 = vmatpush.bf16.msrb.mxu1 %v1039_v42  ;;  %1527 = vmatpush.bf16.msra.mxu2 %v1039_v42  ;;  %v652_v42 = vrot.slane %v651_v6, 2 }
 0x276   :  { %1117 = vmatpush.bf16.msrb.mxu1 %v1038_v23  ;;  %1528 = vmatpush.bf16.msra.mxu2 %v1038_v23 }
 0x27a   :  { %1118 = vmatpush.bf16.msrb.mxu1 %v1037_v34  ;;  %1529 = vmatpush.bf16.msra.mxu2 %v1037_v34 }
 0x27e   :  { %1119 = vmatpush.bf16.msrb.mxu1 %v2299_v57  ;;  %1530 = vmatpush.bf16.msra.mxu2 %v2299_v57  ;;  %v1068_v57 = vpop.permute.xlu2 %1067 }
 0x282   :  { %1120 = vmatpush.bf16.msrb.mxu1 %v2295_v37  ;;  %1531 = vmatpush.bf16.msra.mxu2 %v2295_v37  ;;  %v1507_v37 = vld [vmem:[%s2344_s7 + $0x10] sm:$0xff] }
 0x286   :  { %1121 = vmatpush.bf16.msrb.mxu1 %v2291_v38  ;;  %1532 = vmatpush.bf16.msra.mxu2 %v2291_v38  ;;  %v1167_v38 = vpop.permute.xlu1 %1166  ;;  %v1073_v18 = vpop.permute.xlu2 %1072 }
 0x289   :  { %1122 = vmatmul.bf16.vlgmr.msrb.gmra.mxu1 %v1505_v17  ;;  %1137 = vmatmul.bf16.vlgmr.msra.gmra.mxu2 %v1508_v24  ;;  %v653_v17 = vadd.f32 %v652_v42, %v651_v6 }
 0x28e   :  { %v1078_v47 = vpop.permute.xlu1 %1077  ;;  %v1177_v52 = vpop.permute.xlu2 %1176 }
 0x296   :  { %v1182_v54 = vpop.permute.xlu1 %1181  ;;  %v1088_v15 = vpop.permute.xlu2 %1087 }
 0x299   :  { %1127 = vmatmul.bf16.gmra.mxu1 %v1506_v30 }
 0x29e   :  { %v1192_v43 = vpop.permute.xlu1 %1191  ;;  %v1197_v3 = vpop.permute.xlu2 %1196 }
 0x2a9   :  { %1132 = vmatmul.bf16.gmra.mxu1 %v1507_v37  ;;  %v654_v37 = vrot.slane %v653_v17, 1 }
 0x306   :  { %v1123_v4 = vpop.f32.mrf.mxu1 }
 0x307   :  { %v1124_v34 = vadd.f32 %v1123_v4, %v1053_v55 }
 0x309   :  { %v1143_v58 = vmax.f32 %v1124_v34, 0.0 }
 0x30b   :  { %v1199_v5 = vmul.f32 %v1162_v50, %v1143_v58 }
 0x30c   :  { %v1138_v63 = vpop.f32.mrf.mxu2 }
 0x30d   :  { %v1139_v26 = vadd.f32 %v1138_v63, %v1083_v8 }
 0x30e   :  { %v1125_v36 = vpop.f32.mrf.mxu1 }
 0x30f   :  { %v1126_v49 = vadd.f32 %v1125_v36, %v1058_v12  ;;  %v1149_v35 = vmax.f32 %v1139_v26, 0.0  ;;  %v655_v12 = vadd.f32 %v654_v37, %v653_v17 }
 0x311   :  { %v1144_v56 = vmax.f32 %v1126_v49, 0.0  ;;  %v1205_v20 = vmul.f32 %v1192_v43, %v1149_v35 }
 0x313   :  { %v1200_v14 = vmul.f32 %v1167_v38, %v1144_v56 }
 0x314   :  { %v1140_v44 = vpop.f32.mrf.mxu2 }
 0x315   :  { %v1207_v10 = vadd.f32 %v1200_v14, %v1199_v5  ;;  %v1141_v28 = vadd.f32 %v1140_v44, %v1088_v15 }
 0x316   :  { %v1128_v39 = vpop.f32.mrf.mxu1 }
 0x317   :  { %v1129_v40 = vadd.f32 %v1128_v39, %v1063_v7  ;;  %v1150_v0 = vmax.f32 %v1141_v28, 0.0 }
 0x319   :  { %v1145_v1 = vmax.f32 %v1129_v40, 0.0  ;;  %v1206_v61 = vmul.f32 %v1197_v3, %v1150_v0 }
 0x31b   :  { %v1201_v32 = vmul.f32 %v1172_v45, %v1145_v1 }
 0x31d   :  { %v1208_v21 = vadd.f32 %v1207_v10, %v1201_v32 }
 0x31e   :  { %v1130_v41 = vpop.f32.mrf.mxu1 }
 0x31f   :  { %v1131_v46 = vadd.f32 %v1130_v41, %v1068_v57 }
 0x321   :  { %v1146_v9 = vmax.f32 %v1131_v46, 0.0 }
 0x323   :  { %v1202_v53 = vmul.f32 %v1177_v52, %v1146_v9 }
 0x325   :  { %v1209_v33 = vadd.f32 %v1208_v21, %v1202_v53 }
 0x326   :  { %v1133_v59 = vpop.f32.mrf.mxu1 }
 0x327   :  { %v1134_v2 = vadd.f32 %v1133_v59, %v1073_v18 }
 0x329   :  { %v1147_v11 = vmax.f32 %v1134_v2, 0.0 }
 0x32b   :  { %v1203_v27 = vmul.f32 %v1182_v54, %v1147_v11 }
 0x32d   :  { %v1210_v29 = vadd.f32 %v1209_v33, %v1203_v27 }
 0x32e   :  { %v1135_v22 = vpop.f32.mrf.mxu1 }
 0x32f   :  { %v1136_v62 = vadd.f32 %v1135_v22, %v1078_v47 }
 0x331   :  { %v1148_v19 = vmax.f32 %v1136_v62, 0.0 }
 0x333   :  { %v1204_v60 = vmul.f32 %v1187_v51, %v1148_v19 }
 0x335   :  { %v1211_v16 = vadd.f32 %v1210_v29, %v1204_v60 }
 0x337   :  { %v1212_v13 = vadd.f32 %v1211_v16, %v1205_v20 }
 0x339   :  { %v1213_v48 = vadd.f32 %v1212_v13, %v1206_v61 }
 0x33b   :  { %v1214_v23 = vrot.slane %v1213_v48, 4 }
 0x33d   :  { %v1215_v24 = vadd.f32 %v1214_v23, %v1213_v48 }
 0x33f   :  { %v1216_v30 = vrot.slane %v1215_v24, 2 }
 0x341   :  { %v1217_v55 = vadd.f32 %v1216_v30, %v1215_v24 }
 0x343   :  { %v1218_v4 = vrot.slane %v1217_v55, 1 }
 0x345   :  { %v1219_v7 = vadd.f32 %v1218_v4, %v1217_v55 }
 0x347   :  { %v1220_v57 = vadd.f32 %v1219_v7, %v655_v12 }
 0x349   :  { %v1223_v36 = vadd.f32 %v1222_v31, %v1220_v57 }
 0x34b   :  { %1224 = vst [vmem:[#allocation3] sm:$0x1] %v1223_v36 }
 0x34c   :  { %1235 = dma.vmem_to_hbm [thread:$0]  %s1231_s19, 16, %s1233_s9, [#allocation4]  }
 0x34d   :  { %1565 = dma.done.wait [#allocation4], 16  }
 0x34e   :  { %1566 = vsyncadd [#allocation4], 4294967280 }
 0x34f   :  { %1240 = vsyncpa [#allocation4], 1 }

</bundles_post_ra>
